<compile_context>
chip_gen: v6e
topology: v6e:2x2x1
jax: 0.10.0
libtpu: 0.0.40
codegen_flags: <defaults>
</compile_context>

<pallas_src>
import numpy as np
import jax
import jax.numpy as jnp
from jax import lax
from jax.experimental import pallas as pl
from jax.experimental.pallas import tpu as pltpu

DEG2RAD = 3.1415926 / 180.0

LANES = 128
SUBLANES = 8
MAX_ROWS_PER_TILE = 1024      # 1024 * 128 = 131072 boxes / grid step (~5.5 MiB input block)


def _cdiv(a, b):
    return -(-a // b)


def _round_up(a, b):
    return _cdiv(a, b) * b


def _wloss_kernel(pred_ref, tgt_ref, mask_ref, out_ref):
    """pred_ref / tgt_ref: (5, R, 128) f32 param-major boxes (cx, cy, w, h, theta_deg).
    mask_ref: (R, 128) f32 per-box validity mask (padded boxes == 0).
    out_ref:  (8, 128) f32 lane-dense partial sum of masked per-box losses."""
    rows = mask_ref.shape[0]
    n_groups = rows // SUBLANES

    def group(g, acc):
        r = pl.multiple_of(g * SUBLANES, SUBLANES)
        sl = pl.ds(r, SUBLANES)

        cx1 = pred_ref[0, sl, :]
        cy1 = pred_ref[1, sl, :]
        w1 = pred_ref[2, sl, :]
        h1 = pred_ref[3, sl, :]
        t1 = pred_ref[4, sl, :]
        cx2 = tgt_ref[0, sl, :]
        cy2 = tgt_ref[1, sl, :]
        w2 = tgt_ref[2, sl, :]
        h2 = tgt_ref[3, sl, :]
        t2 = tgt_ref[4, sl, :]
        mask = mask_ref[sl, :]

        w1sq = w1 * w1
        h1sq = h1 * h1
        w2sq = w2 * w2
        h2sq = h2 * h2
        k1 = 0.125 * (w1sq + h1sq)          # Tr(S1) / 2
        m1 = 0.125 * (w1sq - h1sq)
        k2 = 0.125 * (w2sq + h2sq)          # Tr(S2) / 2
        m2 = 0.125 * (w2sq - h2sq)

        # item1 = ||mean1 - mean2||^2
        dx = cx1 - cx2
        dy = cy1 - cy2
        item1 = dx * dx + dy * dy

        # item2 = Tr(S1) + Tr(S2) - 2*sqrt(Tr(S1 S2) + 2*sqrt(det(S1) det(S2)))
        cos2d = jnp.cos((2.0 * DEG2RAD) * (t1 - t2))
        inner = 2.0 * (k1 * k2 + m1 * m2 * cos2d) + 0.125 * (w1 * h1) * (w2 * h2)
        item2 = 2.0 * (k1 + k2) - 2.0 * jnp.sqrt(jnp.maximum(inner, 0.0))

        dist = jnp.sqrt(jnp.clip(item1 + item2 + 1e-8, 0.0, 1e6))
        l_gwd = (1.0 - 1.0 / (dist + 2.0)) * mask   # exact division: free in a mem-bound kernel
        return acc + l_gwd

    acc0 = jnp.zeros((SUBLANES, LANES), jnp.float32)
    out_ref[...] = lax.fori_loop(0, n_groups, group, acc0)


def _forward(pred, target, weight, avg_factor, loss_weight):
    """Pallas WassersteinLoss.forward for 5-parameter (cx, cy, w, h, theta_deg) boxes."""
    n, c = pred.shape
    assert c == 5
    # TODO(synk): the pred.size(1) == 8 path (poly2rbox conversion) is not implemented.

    rows_needed = max(1, _cdiv(n, LANES))
    if rows_needed <= SUBLANES:
        # Tiny problem: one 8-row tile.
        rows_per_tile = SUBLANES
        num_tiles = 1
    else:
        # Aim for >= 2 grid steps so v7x can shard the "parallel" axis over its 2 TCs,
        # while keeping each step <= MAX_ROWS_PER_TILE (~5.5 MiB input block).
        rows_per_tile = min(MAX_ROWS_PER_TILE,
                            _round_up(_cdiv(rows_needed, 2), SUBLANES))
        num_tiles = _cdiv(rows_needed, rows_per_tile)
    total_rows = rows_per_tile * num_tiles
    n_pad = total_rows * LANES

    # valid_idx = weight.nonzero()[:, 0].unique()  ->  per-row validity mask.
    valid = jnp.any(weight != 0, axis=1).astype(jnp.float32)

    def to_param_major(x):
        # (N, 5) -> (5, total_rows, 128); padded boxes are all-zero (and masked out).
        xt = jnp.pad(x.astype(jnp.float32).T, ((0, 0), (0, n_pad - n)))
        return xt.reshape(5, total_rows, LANES)

    pred_s = to_param_major(pred)
    tgt_s = to_param_major(target)
    mask_s = jnp.pad(valid, (0, n_pad - n)).reshape(total_rows, LANES)

    partials = pl.pallas_call(
        _wloss_kernel,
        out_shape=jax.ShapeDtypeStruct((num_tiles * SUBLANES, LANES), jnp.float32),
        grid=(num_tiles,),
        in_specs=[
            pl.BlockSpec((5, rows_per_tile, LANES), lambda i: (0, i, 0)),
            pl.BlockSpec((5, rows_per_tile, LANES), lambda i: (0, i, 0)),
            pl.BlockSpec((rows_per_tile, LANES), lambda i: (i, 0)),
        ],
        out_specs=pl.BlockSpec((SUBLANES, LANES), lambda i: (i, 0)),
        compiler_params=pltpu.CompilerParams(
            dimension_semantics=("parallel",),          # per-tile partials -> both v7x TCs
            vmem_limit_bytes=32 * 1024 * 1024,          # explicit; covers v5e's 16 MiB default
        ),
    )(pred_s, tgt_s, mask_s)

    total = jnp.sum(partials)
    loss = total * loss_weight / avg_factor
    # Original module returns 0 when there are no valid boxes.
    return jnp.where(jnp.sum(valid) > 0, loss, jnp.float32(0.0))


wasserstein_loss = jax.jit(_forward)


# ----------------------------- numpy reference (original algorithm) -----------------------------

def _sqrtm2x2(A):
    w, V = np.linalg.eigh(A)
    return (V * np.sqrt(np.maximum(w, 0.0))) @ V.T


def _reference_loss(pred, target, weight, avg_factor, loss_weight=1.0):
    def get_param(box):
        cx, cy, w, h, th = box
        th = th / 180.0 * 3.1415926
        mean = np.array([cx, cy], dtype=np.float64)
        cov = 0.25 * np.array(
            [[w ** 2 * np.cos(th) ** 2 + h ** 2 * np.sin(th) ** 2,
              (w ** 2 - h ** 2) * np.sin(th) * np.cos(th)],
             [(w ** 2 - h ** 2) * np.sin(th) * np.cos(th),
              w ** 2 * np.sin(th) ** 2 + h ** 2 * np.cos(th) ** 2]],
            dtype=np.float64,
        )
        return mean, cov

    valid = np.any(weight != 0, axis=1)
    total = 0.0
    for i in np.nonzero(valid)[0]:
        m1, c1 = get_param(pred[i])
        m2, c2 = get_param(target[i])
        item1 = np.sum((m1 - m2) ** 2)
        s1 = _sqrtm2x2(c1)
        item2 = np.trace(c1 + c2 - 2.0 * _sqrtm2x2(s1 @ c2 @ s1))
        dist = np.sqrt(np.clip(item1 + item2 + 1e-8, 0.0, 1e6))
        total += 1.0 - 1.0 / (dist + 2.0)
    if not np.any(valid):
        return 0.0
    return total * loss_weight / avg_factor


# ------------------------------------------- main -------------------------------------------

def _make_case(key, n):
    k1, k2, k3 = jax.random.split(key, 3)

    def make_boxes(k):
        kc, ks, kt = jax.random.split(k, 3)
        ctr = jax.random.uniform(kc, (n, 2), minval=0.0, maxval=50.0)
        wh = jax.random.uniform(ks, (n, 2), minval=5.0, maxval=30.0)
        th = jax.random.uniform(kt, (n, 1), minval=-90.0, maxval=90.0)
        return jnp.concatenate([ctr, wh, th], axis=1)

    pred = make_boxes(k1)                                        # (n, 5) cx, cy, w, h, theta(deg)
    target = make_boxes(k2)                                      # (n, 5)
    valid_rows = (jax.random.uniform(k3, (n,)) > 0.25).astype(jnp.float32)
    weight = jnp.broadcast_to(valid_rows[:, None], (n, 5))       # (n, 5)
    avg_factor = float(max(float(jnp.sum(valid_rows)), 1.0))
    return pred, target, weight, avg_factor


def _check(key, n, tol):
    pred, target, weight, avg_factor = _make_case(key, n)
    loss = wasserstein_loss(pred, target, weight, avg_factor, 1.0)
    loss = jax.block_until_ready(loss)
    ref = _reference_loss(
        np.asarray(pred, np.float64),
        np.asarray(target, np.float64),
        np.asarray(weight),
        avg_factor,
        1.0,
    )
    assert np.allclose(float(loss), ref, rtol=tol, atol=tol), (n, float(loss), ref)


if __name__ == "__main__":
    key = jax.random.PRNGKey(0)
    k_small, k_big = jax.random.split(key)

    # Small case (matches the module's typical per-image box count).
    _check(k_small, 8, 1e-4)
    # Medium case exercising padding + the multi-tile ("parallel") grid path.
    _check(k_big, 1100, 1e-4)

    print("KERNEL_OK")
</pallas_src>

<mosaic_0001>
module attributes {stable_mosaic.version = 11 : i64} {
  func.func @_wloss_kernel(%arg0: i32, %arg1: memref<5x8x128xf32, #tpu.memory_space<vmem>>, %arg2: memref<5x8x128xf32, #tpu.memory_space<vmem>>, %arg3: memref<8x128xf32, #tpu.memory_space<vmem>>, %arg4: memref<8x128xf32, #tpu.memory_space<vmem>>) attributes {dimension_semantics = [#tpu.dimension_semantics<parallel>], iteration_bounds = array<i64: 1>, scalar_prefetch = 0 : i64, scratch_operands = 0 : i64, tpu.core_type = #tpu.core_type<tc>, window_params = [{transform_indices = @transform_0, window_bounds = array<i64: 5, 8, 128>}, {transform_indices = @transform_1, window_bounds = array<i64: 5, 8, 128>}, {transform_indices = @transform_2, window_bounds = array<i64: 8, 128>}, {transform_indices = @transform_3, window_bounds = array<i64: 8, 128>}]} {
    %cst = arith.constant 0.000000e+00 : f32
    %0 = vector.broadcast %cst : f32 to vector<8x128xf32>
    %c0_i32 = arith.constant 0 : i32
    %c8_i32 = arith.constant 8 : i32
    %1 = arith.muli %c0_i32, %c8_i32 : i32
    %2 = tpu.assume_multiple %1, 8 : i32
    %c0 = arith.constant 0 : index
    %3 = arith.index_cast %2 : i32 to index
    %c0_0 = arith.constant 0 : index
    %4 = vector.load %arg1[%c0, %3, %c0_0] : memref<5x8x128xf32, #tpu.memory_space<vmem>>, vector<1x8x128xf32>
    %5 = vector.shape_cast %4 : vector<1x8x128xf32> to vector<8x128xf32>
    %c1 = arith.constant 1 : index
    %6 = arith.index_cast %2 : i32 to index
    %c0_1 = arith.constant 0 : index
    %7 = vector.load %arg1[%c1, %6, %c0_1] : memref<5x8x128xf32, #tpu.memory_space<vmem>>, vector<1x8x128xf32>
    %8 = vector.shape_cast %7 : vector<1x8x128xf32> to vector<8x128xf32>
    %c2 = arith.constant 2 : index
    %9 = arith.index_cast %2 : i32 to index
    %c0_2 = arith.constant 0 : index
    %10 = vector.load %arg1[%c2, %9, %c0_2] : memref<5x8x128xf32, #tpu.memory_space<vmem>>, vector<1x8x128xf32>
    %11 = vector.shape_cast %10 : vector<1x8x128xf32> to vector<8x128xf32>
    %c3 = arith.constant 3 : index
    %12 = arith.index_cast %2 : i32 to index
    %c0_3 = arith.constant 0 : index
    %13 = vector.load %arg1[%c3, %12, %c0_3] : memref<5x8x128xf32, #tpu.memory_space<vmem>>, vector<1x8x128xf32>
    %14 = vector.shape_cast %13 : vector<1x8x128xf32> to vector<8x128xf32>
    %c4 = arith.constant 4 : index
    %15 = arith.index_cast %2 : i32 to index
    %c0_4 = arith.constant 0 : index
    %16 = vector.load %arg1[%c4, %15, %c0_4] : memref<5x8x128xf32, #tpu.memory_space<vmem>>, vector<1x8x128xf32>
    %17 = vector.shape_cast %16 : vector<1x8x128xf32> to vector<8x128xf32>
    %c0_5 = arith.constant 0 : index
    %18 = arith.index_cast %2 : i32 to index
    %c0_6 = arith.constant 0 : index
    %19 = vector.load %arg2[%c0_5, %18, %c0_6] : memref<5x8x128xf32, #tpu.memory_space<vmem>>, vector<1x8x128xf32>
    %20 = vector.shape_cast %19 : vector<1x8x128xf32> to vector<8x128xf32>
    %c1_7 = arith.constant 1 : index
    %21 = arith.index_cast %2 : i32 to index
    %c0_8 = arith.constant 0 : index
    %22 = vector.load %arg2[%c1_7, %21, %c0_8] : memref<5x8x128xf32, #tpu.memory_space<vmem>>, vector<1x8x128xf32>
    %23 = vector.shape_cast %22 : vector<1x8x128xf32> to vector<8x128xf32>
    %c2_9 = arith.constant 2 : index
    %24 = arith.index_cast %2 : i32 to index
    %c0_10 = arith.constant 0 : index
    %25 = vector.load %arg2[%c2_9, %24, %c0_10] : memref<5x8x128xf32, #tpu.memory_space<vmem>>, vector<1x8x128xf32>
    %26 = vector.shape_cast %25 : vector<1x8x128xf32> to vector<8x128xf32>
    %c3_11 = arith.constant 3 : index
    %27 = arith.index_cast %2 : i32 to index
    %c0_12 = arith.constant 0 : index
    %28 = vector.load %arg2[%c3_11, %27, %c0_12] : memref<5x8x128xf32, #tpu.memory_space<vmem>>, vector<1x8x128xf32>
    %29 = vector.shape_cast %28 : vector<1x8x128xf32> to vector<8x128xf32>
    %c4_13 = arith.constant 4 : index
    %30 = arith.index_cast %2 : i32 to index
    %c0_14 = arith.constant 0 : index
    %31 = vector.load %arg2[%c4_13, %30, %c0_14] : memref<5x8x128xf32, #tpu.memory_space<vmem>>, vector<1x8x128xf32>
    %32 = vector.shape_cast %31 : vector<1x8x128xf32> to vector<8x128xf32>
    %33 = arith.index_cast %2 : i32 to index
    %c0_15 = arith.constant 0 : index
    %34 = vector.load %arg3[%33, %c0_15] : memref<8x128xf32, #tpu.memory_space<vmem>>, vector<8x128xf32>
    %35 = arith.mulf %11, %11 : vector<8x128xf32>
    %36 = arith.mulf %14, %14 : vector<8x128xf32>
    %37 = arith.mulf %26, %26 : vector<8x128xf32>
    %38 = arith.mulf %29, %29 : vector<8x128xf32>
    %39 = arith.addf %35, %36 : vector<8x128xf32>
    %cst_16 = arith.constant 1.250000e-01 : f32
    %40 = vector.broadcast %cst_16 : f32 to vector<8x128xf32>
    %41 = arith.mulf %40, %39 : vector<8x128xf32>
    %42 = arith.subf %35, %36 : vector<8x128xf32>
    %cst_17 = arith.constant 1.250000e-01 : f32
    %43 = vector.broadcast %cst_17 : f32 to vector<8x128xf32>
    %44 = arith.mulf %43, %42 : vector<8x128xf32>
    %45 = arith.addf %37, %38 : vector<8x128xf32>
    %cst_18 = arith.constant 1.250000e-01 : f32
    %46 = vector.broadcast %cst_18 : f32 to vector<8x128xf32>
    %47 = arith.mulf %46, %45 : vector<8x128xf32>
    %48 = arith.subf %37, %38 : vector<8x128xf32>
    %cst_19 = arith.constant 1.250000e-01 : f32
    %49 = vector.broadcast %cst_19 : f32 to vector<8x128xf32>
    %50 = arith.mulf %49, %48 : vector<8x128xf32>
    %51 = arith.subf %5, %20 : vector<8x128xf32>
    %52 = arith.subf %8, %23 : vector<8x128xf32>
    %53 = arith.mulf %51, %51 : vector<8x128xf32>
    %54 = arith.mulf %52, %52 : vector<8x128xf32>
    %55 = arith.addf %53, %54 : vector<8x128xf32>
    %56 = arith.subf %17, %32 : vector<8x128xf32>
    %cst_20 = arith.constant 0.0349065848 : f32
    %57 = vector.broadcast %cst_20 : f32 to vector<8x128xf32>
    %58 = arith.mulf %57, %56 : vector<8x128xf32>
    %59 = math.cos %58 : vector<8x128xf32>
    %60 = arith.mulf %41, %47 : vector<8x128xf32>
    %61 = arith.mulf %44, %50 : vector<8x128xf32>
    %62 = arith.mulf %61, %59 : vector<8x128xf32>
    %63 = arith.addf %60, %62 : vector<8x128xf32>
    %cst_21 = arith.constant 2.000000e+00 : f32
    %64 = vector.broadcast %cst_21 : f32 to vector<8x128xf32>
    %65 = arith.mulf %64, %63 : vector<8x128xf32>
    %66 = arith.mulf %11, %14 : vector<8x128xf32>
    %cst_22 = arith.constant 1.250000e-01 : f32
    %67 = vector.broadcast %cst_22 : f32 to vector<8x128xf32>
    %68 = arith.mulf %67, %66 : vector<8x128xf32>
    %69 = arith.mulf %26, %29 : vector<8x128xf32>
    %70 = arith.mulf %68, %69 : vector<8x128xf32>
    %71 = arith.addf %65, %70 : vector<8x128xf32>
    %72 = arith.addf %41, %47 : vector<8x128xf32>
    %cst_23 = arith.constant 2.000000e+00 : f32
    %73 = vector.broadcast %cst_23 : f32 to vector<8x128xf32>
    %74 = arith.mulf %73, %72 : vector<8x128xf32>
    %cst_24 = arith.constant 0.000000e+00 : f32
    %75 = vector.broadcast %cst_24 : f32 to vector<8x128xf32>
    %76 = arith.maximumf %71, %75 : vector<8x128xf32>
    %77 = math.sqrt %76 : vector<8x128xf32>
    %cst_25 = arith.constant 2.000000e+00 : f32
    %78 = vector.broadcast %cst_25 : f32 to vector<8x128xf32>
    %79 = arith.mulf %78, %77 : vector<8x128xf32>
    %80 = arith.subf %74, %79 : vector<8x128xf32>
    %81 = arith.addf %55, %80 : vector<8x128xf32>
    %cst_26 = arith.constant 9.99999993E-9 : f32
    %82 = vector.broadcast %cst_26 : f32 to vector<8x128xf32>
    %83 = arith.addf %81, %82 : vector<8x128xf32>
    %cst_27 = arith.constant 0.000000e+00 : f32
    %cst_28 = arith.constant 1.000000e+06 : f32
    %84 = vector.broadcast %cst_27 : f32 to vector<8x128xf32>
    %85 = arith.maximumf %84, %83 : vector<8x128xf32>
    %86 = vector.broadcast %cst_28 : f32 to vector<8x128xf32>
    %87 = arith.minimumf %86, %85 : vector<8x128xf32>
    %88 = math.sqrt %87 : vector<8x128xf32>
    %cst_29 = arith.constant 2.000000e+00 : f32
    %89 = vector.broadcast %cst_29 : f32 to vector<8x128xf32>
    %90 = arith.addf %88, %89 : vector<8x128xf32>
    %cst_30 = arith.constant 1.000000e+00 : f32
    %91 = vector.broadcast %cst_30 : f32 to vector<8x128xf32>
    %92 = arith.divf %91, %90 : vector<8x128xf32>
    %cst_31 = arith.constant 1.000000e+00 : f32
    %93 = vector.broadcast %cst_31 : f32 to vector<8x128xf32>
    %94 = arith.subf %93, %92 : vector<8x128xf32>
    %95 = arith.mulf %94, %34 : vector<8x128xf32>
    %96 = arith.addf %0, %95 : vector<8x128xf32>
    %c1_i32 = arith.constant 1 : i32
    %c0_32 = arith.constant 0 : index
    %c0_33 = arith.constant 0 : index
    %97 = vector.load %arg4[%c0_32, %c0_33] : memref<8x128xf32, #tpu.memory_space<vmem>>, vector<8x128xf32>
    tpu.vector_store %arg4[%c0_32, %c0_33], %96 {strides = array<i32>} : memref<8x128xf32, #tpu.memory_space<vmem>>, vector<8x128xf32>,
    return
  }
  func.func @transform_0(%arg0: i32) -> (i32, i32, i32) {
    %c0_i32 = arith.constant 0 : i32
    %c0_i32_0 = arith.constant 0 : i32
    %c0_i32_1 = arith.constant 0 : i32
    return %c0_i32, %arg0, %c0_i32_0 : i32, i32, i32
  }
  func.func @transform_1(%arg0: i32) -> (i32, i32, i32) {
    %c0_i32 = arith.constant 0 : i32
    %c0_i32_0 = arith.constant 0 : i32
    %c0_i32_1 = arith.constant 0 : i32
    return %c0_i32, %arg0, %c0_i32_0 : i32, i32, i32
  }
  func.func @transform_2(%arg0: i32) -> (i32, i32) {
    %c0_i32 = arith.constant 0 : i32
    %c0_i32_0 = arith.constant 0 : i32
    return %arg0, %c0_i32 : i32, i32
  }
  func.func @transform_3(%arg0: i32) -> (i32, i32) {
    %c0_i32 = arith.constant 0 : i32
    %c0_i32_0 = arith.constant 0 : i32
    return %arg0, %c0_i32 : i32, i32
  }
}

</mosaic_0001>

<bundles_post_ra>
// kernel: _forward.1
= control target key start
LH: loop header
LB: loop body
LE: loop exit
PB: predicated region body
PF: predicated region fallthrough
CT: control target
= control target key end

     0   :  { %v243_v47 = vmov 683565275   ;;  %v244_v49 = vmov 2475754826   ;;  %v245_v51 = vmov 2131351028   ;;  %s341_s0 = inlined_call_operand.vmem [shape: f32[5,8,128], index: 0, kind: input, shape index: {}]   ;;  %s342_s1 = inlined_call_operand.vmem [shape: f32[5,8,128], index: 1, kind: input, shape index: {}]   ;;  %s343_s2 = inlined_call_operand.vmem [shape: f32[8,128], index: 2, kind: input, shape index: {}]   ;;  %s344_s3 = inlined_call_operand.vmem [shape: f32[8,128], index: 3, kind: output, shape index: {}]  }
   0x1   :  { %v14_v0 = vld [vmem:[%s341_s0] sm:$0xff]  ;;  %v211_v1 = vld [vmem:[%s341_s0 + $0x8] sm:$0xff]  ;;  %v212_v2 = vld [vmem:[%s341_s0 + $0x10] sm:$0xff]  ;;  %v246_v53 = vmov 2102212464  }
   0x2   :  { %v213_v3 = vld [vmem:[%s341_s0 + $0x18] sm:$0xff]  ;;  %v214_v4 = vld [vmem:[%s341_s0 + $0x20] sm:$0xff]  ;;  %v37_v6 = vmul.f32 %v212_v2, %v212_v2  ;;  %v215_v7 = vld [vmem:[%s342_s1 + $0x8] sm:$0xff]  ;;  %v247_v55 = vmov 920167782  }
   0x3   :  { %v27_v5 = vld [vmem:[%s342_s1] sm:$0xff]  ;;  %v216_v8 = vld [vmem:[%s342_s1 + $0x10] sm:$0xff]  ;;  %v217_v9 = vld [vmem:[%s342_s1 + $0x18] sm:$0xff]  ;;  %v38_v10 = vmul.f32 %v213_v3, %v213_v3  ;;  %v164_v12 = vmul.f32 %v213_v3, %v212_v2  ;;  %v50_v16 = vsub.f32 %v211_v1, %v215_v7  ;;  %v248_v62 = vmov 1326507024  }
   0x4   :  { %v49_v11 = vsub.f32 %v14_v0, %v27_v5  ;;  %v218_v13 = vld [vmem:[%s342_s1 + $0x20] sm:$0xff]  ;;  %v39_v14 = vmul.f32 %v216_v8, %v216_v8  ;;  %v40_v15 = vmul.f32 %v217_v9, %v217_v9  ;;  %v166_v17 = vmul.f32 %v217_v9, %v216_v8 }
   0x5   :  { %v41_v18 = vadd.f32 %v38_v10, %v37_v6  ;;  %v43_v19 = vsub.f32 %v37_v6, %v38_v10  ;;  %v54_v21 = vsub.f32 %v214_v4, %v218_v13  ;;  %v52_v24 = vmul.f32 %v50_v16, %v50_v16 }
   0x6   :  { %v51_v20 = vmul.f32 %v49_v11, %v49_v11  ;;  %v45_v22 = vadd.f32 %v40_v15, %v39_v14  ;;  %v47_v23 = vsub.f32 %v39_v14, %v40_v15  ;;  %v165_v25 = vmul.f32 0.125, %v164_v12 }
   0x7   :  { %v42_v26 = vmul.f32 0.125, %v41_v18  ;;  %v44_v27 = vmul.f32 0.125, %v43_v19  ;;  %v299_v28 = vmul.f32 0.034906585, %v54_v21 }
   0x8   :  { %v46_v29 = vmul.f32 0.125, %v45_v22  ;;  %v48_v30 = vmul.f32 0.125, %v47_v23  ;;  %v301_v31 = vadd.f32 %v52_v24, %v51_v20  ;;  %v303_v32 = vmul.f32 %v166_v17, %v165_v25 }
   0x9   :  { %v59_v33 = vand.u32 2139095040, %v299_v28  ;;  %v56_v38 = vand.u32 2147483647, %v299_v28  ;;  %vm58_vm7 = vcmp.lt.s32.totalorder %v299_v28, 0  ;;  %vm148_vm12 = vweird.f32 %v299_v28 }
   0xa   :  { %v306_v34 = vmul.f32 %v46_v29, %v42_v26  ;;  %v308_v35 = vmul.f32 %v48_v30, %v44_v27  ;;  %v310_v36 = vadd.f32 %v46_v29, %v42_v26 }
   0xb   :  { %v60_v37 = vshrl.u32 %v59_v33, 23  ;;  %v63_v41 = vand.u32 8388607, %v56_v38  ;;  %vm57_vm8 = vcmp.le.f32.partialorder %v56_v38, 0.7853982 }
   0xd   :  { %v219_v39 = vadd.s32 4294967169, %v60_v37  ;;  %v64_v44 = vor.u32 8388608, %v63_v41 }
   0xf   :  { %v66_v40 = vadd.s32 1, %v219_v39  ;;  %v104_v0 = vshll.u32 %v64_v44, 8 }
  0x11   :  { %vm67_vm0 = vcmp.gt.s32.totalorder %v66_v40, 0 }
  0x12   :  { %v68_v42 = vsel %vm67_vm0, %v66_v40, 0 }
  0x13   :  { %v70_v43 = vand.u32 31, %v68_v42  ;;  %v69_v45 = vshrl.u32 %v68_v42, 5 }
  0x15   :  { %v71_v46 = vsub.s32 32, %v70_v43  ;;  %v73_v48 = vshll.u32 %v243_v47, %v70_v43  ;;  %v76_v50 = vshll.u32 %v244_v49, %v70_v43  ;;  %v79_v52 = vshll.u32 %v245_v51, %v70_v43 }
  0x16   :  { %v82_v54 = vshll.u32 %v246_v53, %v70_v43  ;;  %v85_v56 = vshll.u32 %v247_v55, %v70_v43  ;;  %vm88_vm1 = vcmp.lt.s32.totalorder %v69_v45, 1  ;;  %vm91_vm2 = vcmp.lt.s32.totalorder %v69_v45, 4 }
  0x17   :  { %v72_v57 = vshrl.u32 %v243_v47, %v71_v46  ;;  %v74_v58 = vshrl.u32 %v244_v49, %v71_v46  ;;  %v77_v59 = vshrl.u32 %v245_v51, %v71_v46  ;;  %v80_v60 = vshrl.u32 %v246_v53, %v71_v46 }
  0x18   :  { %v83_v61 = vshrl.u32 %v247_v55, %v71_v46  ;;  %v86_v63 = vshrl.u32 %v248_v62, %v71_v46  ;;  %vm89_vm3 = vcmp.lt.s32.totalorder %v69_v45, 2  ;;  %vm90_vm4 = vcmp.lt.s32.totalorder %v69_v45, 3 }
  0x19   :  { %v75_v1 = vor.u32 %v74_v58, %v73_v48  ;;  %v78_v2 = vor.u32 %v77_v59, %v76_v50  ;;  %v81_v3 = vor.u32 %v80_v60, %v79_v52 }
  0x1a   :  { %v84_v4 = vor.u32 %v83_v61, %v82_v54  ;;  %v87_v5 = vor.u32 %v86_v63, %v85_v56 }
  0x1b   :  { %v92_v6 = vsel %vm88_vm1, %v72_v57, %v75_v1  ;;  %v93_v7 = vsel %vm91_vm2, %v81_v3, 2102212464  ;;  %v96_v8 = vsel %vm88_vm1, %v75_v1, %v78_v2  ;;  %v100_v9 = vsel %vm88_vm1, %v78_v2, %v81_v3 }
  0x1c   :  { %v94_v10 = vsel %vm90_vm4, %v78_v2, %v93_v7  ;;  %v97_v11 = vsel %vm91_vm2, %v84_v4, 920167782  ;;  %v101_v12 = vsel %vm91_vm2, %v87_v5, 1326507024 }
  0x1d   :  { %v98_v13 = vsel %vm90_vm4, %v81_v3, %v97_v11  ;;  %v102_v14 = vsel %vm90_vm4, %v84_v4, %v101_v12  ;;  %v95_v15 = vsel %vm89_vm3, %v92_v6, %v94_v10 }
  0x1e   :  { %v99_v16 = vsel %vm89_vm3, %v96_v8, %v98_v13  ;;  %v103_v17 = vsel %vm89_vm3, %v100_v9, %v102_v14  ;;  %v111_v22 = vmul.u32 %v104_v0, %v95_v15 }
  0x1f   :  { %v315_v18 = vmul.u32.u64.low %v104_v0, %v103_v17  ;;  %v316_v19 = vmul.u32.u64.high %v104_v0, %v103_v17, %v315_v18  ;;  %v318_v20 = vmul.u32.u64.low %v104_v0, %v99_v16  ;;  %v319_v21 = vmul.u32.u64.high %v104_v0, %v99_v16, %v318_v20 }
  0x21   :  { %vm113_vm5 = vc.u32 %v316_v19, %v318_v20  ;;  %v114_v23 = vadd.s32 1, %v319_v21  ;;  %v112_v41 = vadd.s32 %v318_v20, %v316_v19 }
  0x23   :  { %v115_v24 = vsel %vm113_vm5, %v114_v23, %v319_v21  ;;  %v36_v23 = vld [vmem:[%s343_s2] sm:$0xff] }
  0x24   :  { %v116_v25 = vadd.s32 %v115_v24, %v111_v22 }
  0x26   :  { %v117_v26 = vadd.s32 536870912, %v116_v25 }
  0x28   :  { %v118_v27 = vshrl.u32 %v117_v26, 30 }
  0x2a   :  { %v119_v29 = vshll.u32 %v118_v27, 30  ;;  %v142_v56 = vsub.s32 4, %v118_v27 }
  0x2c   :  { %v120_v30 = vsub.s32 %v116_v25, %v119_v29  ;;  %v143_v58 = vsel %vm58_vm7, %v142_v56, %v118_v27 }
  0x2d   :  { %v145_v59 = vsel %vm57_vm8, 0, %v143_v58 }
  0x2e   :  { %v122_v33 = vsub.s32 0, %v120_v30  ;;  %v149_v60 = vand.u32 3, %v145_v59 }
  0x30   :  { %v220_v37 = vmin.u32 %v122_v33, %v120_v30  ;;  %vm154_vm9 = vcmp.eq.s32.totalorder %v149_v60, 2  ;;  %vm151_vm10 = vcmp.eq.s32.totalorder %v149_v60, 0  ;;  %vm150_vm11 = vcmp.lt.s32.totalorder %v149_v60, 2 }
  0x32   :  { %v124_v39 = vclz %v220_v37 }
  0x34   :  { %v221_v40 = vadd.s32 4294967294, %v124_v39 }
  0x36   :  { %vm222_vm6 = vcmp.lt.s32.totalorder %v221_v40, 0 }
  0x37   :  { %v127_v42 = vsel %vm222_vm6, 0, %v221_v40 }
  0x38   :  { %v128_v43 = vsub.s32 32, %v127_v42  ;;  %v129_v44 = vshll.u32 %v120_v30, %v127_v42  ;;  %v132_v45 = vsub.s32 4294967266, %v127_v42 }
  0x3a   :  { %v130_v46 = vshrl.u32 %v112_v41, %v128_v43  ;;  %v133_v47 = vadd.s32 127, %v132_v45 }
  0x3c   :  { %v131_v48 = vor.u32 %v130_v46, %v129_v44  ;;  %v134_v49 = vshll.u32 %v133_v47, 23 }
  0x3e   :  { %v135_v50 = vor.u32 4788187, %v134_v49  ;;  %v138_v51 = vcvt.s32.f32 %v131_v48 }
  0x40   :  { %v136_v52 = vand.u32 2147483647, %v135_v50 }
  0x42   :  { %v139_v53 = vmul.f32 %v138_v51, %v136_v52 }
  0x44   :  { %v140_v54 = vxor.u32 2147483648, %v139_v53 }
  0x46   :  { %v141_v55 = vsel %vm58_vm7, %v140_v54, %v139_v53 }
  0x47   :  { %v144_v57 = vsel %vm57_vm8, %v299_v28, %v141_v55  ;;  %v170_v28 = vmul.f32 2.0, %v310_v36 }
  0x48   :  { %233 = vcosq.f32 %v144_v57 }
  0x49   :  { %235 = vsinq.f32 %v144_v57 }
  0x55   :  { %v234_v61 = vpop.eup %233 }
  0x56   :  { %v236_v62 = vpop.eup %235  ;;  %v155_v63 = vxor.u32 2147483648, %v234_v61 }
  0x57   :  { %v152_v0 = vxor.u32 2147483648, %v236_v62 }
  0x58   :  { %v156_v38 = vsel %vm154_vm9, %v155_v63, %v236_v62 }
  0x59   :  { %v153_v1 = vsel %vm151_vm10, %v234_v61, %v152_v0 }
  0x5a   :  { %v157_v2 = vsel %vm150_vm11, %v153_v1, %v156_v38 }
  0x5b   :  { %v158_v3 = vsel %vm148_vm12, nan, %v157_v2 }
  0x5c   :  { %v161_v4 = vmul.f32 %v308_v35, %v158_v3 }
  0x5e   :  { %v162_v5 = vadd.f32 %v161_v4, %v306_v34 }
  0x60   :  { %v163_v6 = vmul.f32 2.0, %v162_v5 }
  0x62   :  { %v168_v7 = vadd.f32 %v303_v32, %v163_v6 }
  0x64   :  { %v171_v8 = vmax.f32 %v168_v7, 0.0 }
  0x66   :  { %237 = vrsqrt.f32 %v171_v8  ;;  %vm174_vm13 = vcmp.eq.f32.partialorder %v171_v8, inf  ;;  %v177_v10 = vand.u32 2147483648, %v171_v8  ;;  %vm176_vm14 = vcmp.eq.f32.partialorder %v171_v8, 0.0 }
  0x73   :  { %v238_v9 = vpop.eup %237 }
  0x74   :  { %v173_v11 = vmul.f32 %v238_v9, %v171_v8 }
  0x76   :  { %v175_v12 = vsel %vm174_vm13, %v171_v8, %v173_v11 }
  0x77   :  { %v178_v13 = vsel %vm176_vm14, %v177_v10, %v175_v12 }
  0x78   :  { %v179_v14 = vmul.f32 2.0, %v178_v13 }
  0x7a   :  { %v180_v15 = vsub.f32 %v170_v28, %v179_v14 }
  0x7c   :  { %v181_v35 = vadd.f32 %v180_v15, %v301_v31 }
  0x7e   :  { %v182_v16 = vadd.f32 1e-08, %v181_v35 }
  0x80   :  { %v183_v34 = vmax.f32 %v182_v16, 0.0 }
  0x82   :  { %v184_v17 = vmin.f32 %v183_v34, 1000000.0 }
  0x84   :  { %239 = vrsqrt.f32 %v184_v17  ;;  %vm187_vm15 = vcmp.eq.f32.partialorder %v184_v17, inf  ;;  %v190_v18 = vand.u32 2147483648, %v184_v17  ;;  %vm189_vm0 = vcmp.eq.f32.partialorder %v184_v17, 0.0 }
  0x91   :  { %v240_v32 = vpop.eup %239 }
  0x92   :  { %v186_v19 = vmul.f32 %v240_v32, %v184_v17 }
  0x94   :  { %v188_v20 = vsel %vm187_vm15, %v184_v17, %v186_v19 }
  0x95   :  { %v191_v21 = vsel %vm189_vm0, %v190_v18, %v188_v20 }
  0x96   :  { %v192_v22 = vadd.f32 2.0, %v191_v21 }
  0x98   :  { %241 = vrcp.f32 %v192_v22 }
  0xa5   :  { %v242_v36 = vpop.eup %241 }
  0xa6   :  { %v195_v24 = vsub.f32 1.0, %v242_v36 }
  0xa8   :  { %v196_v31 = vmul.f32 %v195_v24, %v36_v23 }
  0xaa   :  { %198 = vst [vmem:[%s344_s3] sm:$0xff] %v196_v31 }

</bundles_post_ra>
